<compile_context>
chip_gen: v7x
topology: tpu7x:2x2x1
jax: 0.10.0
libtpu: 0.0.40
codegen_flags: <defaults>
</compile_context>

<pallas_src>
import jax
import jax.numpy as jnp
from jax import lax
from jax.experimental import pallas as pl
from jax.experimental.pallas import tpu as pltpu


def _choose_tm(B: int, T: int, max_block_rows: int) -> int:
    """Rows per grid step: a multiple of T that divides n=B*T, sublane-legal.

    Prefers the largest tile <= max_block_rows that still leaves >= 2 grid
    steps (keeps both v7x TensorCores busy); falls back to the largest legal
    tile, then to the full array (always layout-legal).
    """
    n = B * T
    candidates = []
    for k in range(1, B + 1):
        if B % k:
            continue
        tm = k * T
        # (8, 128) rule: second-to-last block dim must be a multiple of 8
        # unless the block spans the full array extent.
        if tm % 8 != 0 and tm != n:
            continue
        candidates.append(tm)
    multi = [tm for tm in candidates if tm <= max_block_rows and n // tm >= 2]
    if multi:
        return max(multi)
    small = [tm for tm in candidates if tm <= max_block_rows]
    if small:
        return max(small)
    return n


def _embed_kernel(tok_ids_ref, tok_tbl_ref, pos_slab_ref, o_ref):
    """One grid step: gather TM token rows via one-hot MXU matmul + pos add.

    tok_ids_ref:  (TM, 1) int32 -- token ids for this tile
    tok_tbl_ref:  (V, E)        -- full token table, VMEM resident (Buffered(1))
    pos_slab_ref: (TM, E)       -- tile(pos_table[:T]) slab, VMEM resident
    o_ref:        (TM, E)       -- output tile (lane-dense stores)
    """
    TM = o_ref.shape[0]
    V = tok_tbl_ref.shape[0]

    tok_ids = tok_ids_ref[...]  # (TM, 1)

    # One-hot gather on the MXU: (TM, V) @ (V, E) is an exact row select.
    onehot = (tok_ids == lax.broadcasted_iota(jnp.int32, (TM, V), 1)
              ).astype(tok_tbl_ref.dtype)
    acc = jnp.dot(onehot, tok_tbl_ref[...], preferred_element_type=jnp.float32)

    # Positions repeat arange(T) per sequence and each tile covers whole
    # sequences, so the position contribution is a fixed per-tile slab.
    o_ref[...] = (acc + pos_slab_ref[...].astype(jnp.float32)).astype(o_ref.dtype)


def embed_forward(x, token_table, pos_table, *, max_block_rows: int = 1024):
    """x: (B, T) int32, token_table: (V, E), pos_table: (max_ctx, E) -> (B, T, E)."""
    B, T = x.shape
    V, E = token_table.shape
    MAXC, E2 = pos_table.shape
    assert E == E2 and T <= MAXC
    assert token_table.dtype == pos_table.dtype

    n = B * T
    TM = _choose_tm(B, T, max_block_rows)
    assert n % TM == 0 and TM % T == 0
    grid = (n // TM,)

    tok_ids = x.reshape(n, 1).astype(jnp.int32)            # (n, 1)
    pos_slab = jnp.tile(pos_table[:T], (TM // T, 1))        # (TM, E), one tiny XLA op

    # ---- VMEM budget (v7x: 64 MiB/TC; v5e/v6e: 128 MiB) --------------------
    itemsize = jnp.dtype(token_table.dtype).itemsize
    vmem_needed = (
        V * E * itemsize          # resident token table (single-buffered)
        + TM * E * itemsize       # resident position slab (single-buffered)
        + 2 * TM * E * itemsize   # double-buffered output tiles
        + 2 * TM * 128 * 4        # double-buffered (TM,1) id tiles (lane-padded)
        + TM * max(V, 128) * 4    # (TM, V) f32 one-hot intermediate
    )
    assert vmem_needed < 56 * 1024 * 1024, (
        "resident-table one-hot design exceeds the v7x VMEM budget; "
        "switch to the scalar-prefetch row-gather design (see TODO above)")
    vmem_limit = min(64 * 1024 * 1024, max(32 * 1024 * 1024, 2 * vmem_needed))

    out_flat = pl.pallas_call(
        _embed_kernel,
        grid_spec=pltpu.PrefetchScalarGridSpec(
            num_scalar_prefetch=0,
            grid=grid,
            in_specs=[
                # token ids tile (only remaining id stream)
                pl.BlockSpec((TM, 1), lambda i: (i, 0)),
                # full token table, constant index -> single buffer suffices
                pl.BlockSpec((V, E), lambda i: (0, 0),
                             pipeline_mode=pl.Buffered(1)),
                # position slab, constant index -> single buffer
                pl.BlockSpec((TM, E), lambda i: (0, 0),
                             pipeline_mode=pl.Buffered(1)),
            ],
            # lane-dense (TM, E) output tile -> unmasked vst stores
            out_specs=pl.BlockSpec((TM, E), lambda i: (i, 0)),
        ),
        out_shape=jax.ShapeDtypeStruct((n, E), token_table.dtype),
        compiler_params=pltpu.CompilerParams(
            dimension_semantics=("parallel",),   # shard tiles across v7x TCs
            vmem_limit_bytes=int(vmem_limit)),
    )(tok_ids, token_table, pos_slab)

    # n = B*T exactly (no padding), so this reshape is metadata-only.
    return out_flat.reshape(B, T, E)


if __name__ == "__main__":
    # Module hyperparams (small, synthetic)
    vocab_size = 64
    embed_size = 128          # lane-aligned hidden size
    max_context_len = 16

    B, T = 2, 8               # batch, sequence length (T <= max_context_len)

    key = jax.random.PRNGKey(0)
    k_tok, k_pos, k_x = jax.random.split(key, 3)

    # Deterministic "nn.Embedding" weights (N(0,1), like PyTorch's default init)
    token_table = jax.random.normal(k_tok, (vocab_size, embed_size), dtype=jnp.float32)
    pos_table = jax.random.normal(k_pos, (max_context_len, embed_size), dtype=jnp.float32)

    # Integer token ids
    x = jax.random.randint(k_x, (B, T), 0, vocab_size, dtype=jnp.int32)

    out = embed_forward(x, token_table, pos_table)
    out = jax.block_until_ready(out)

    # Pure-JAX reference for sanity
    ref = token_table[x] + pos_table[jnp.arange(T)]
    assert out.shape == (B, T, embed_size)
    assert jnp.allclose(out, ref, atol=1e-5), "mismatch vs reference"

    print("KERNEL_OK")
</pallas_src>

<mosaic_0001>
module attributes {stable_mosaic.version = 11 : i64} {
  func.func @_embed_kernel(%arg0: i32, %arg1: memref<8x1xi32, #tpu.memory_space<vmem>>, %arg2: memref<64x128xf32, #tpu.memory_space<vmem>>, %arg3: memref<8x128xf32, #tpu.memory_space<vmem>>, %arg4: memref<8x128xf32, #tpu.memory_space<vmem>>) attributes {dimension_semantics = [#tpu.dimension_semantics<parallel>], iteration_bounds = array<i64: 2>, scalar_prefetch = 0 : i64, scratch_operands = 0 : i64, tpu.core_type = #tpu.core_type<tc>, window_params = [{transform_indices = @transform_0, window_bounds = array<i64: 8, 1>}, {pipeline_mode = #tpu.pipeline_mode<synchronous>, transform_indices = @transform_1, window_bounds = array<i64: 64, 128>}, {pipeline_mode = #tpu.pipeline_mode<synchronous>, transform_indices = @transform_2, window_bounds = array<i64: 8, 128>}, {transform_indices = @transform_3, window_bounds = array<i64: 8, 128>}]} {
    %c0 = arith.constant 0 : index
    %c0_0 = arith.constant 0 : index
    %0 = vector.load %arg1[%c0, %c0_0] : memref<8x1xi32, #tpu.memory_space<vmem>>, vector<8x1xi32>
    %1 = tpu.iota {dimensions = array<i32: 1>} : vector<8x64xi32>
    %2 = vector.broadcast %0 : vector<8x1xi32> to vector<8x64xi32>
    %3 = arith.cmpi eq, %2, %1 : vector<8x64xi32>
    %4 = arith.extui %3 : vector<8x64xi1> to vector<8x64xi32>
    %5 = arith.sitofp %4 : vector<8x64xi32> to vector<8x64xf32>
    %c0_1 = arith.constant 0 : index
    %c0_2 = arith.constant 0 : index
    %6 = vector.load %arg2[%c0_1, %c0_2] : memref<64x128xf32, #tpu.memory_space<vmem>>, vector<64x128xf32>
    %cst = arith.constant dense<0.000000e+00> : vector<8x128xf32>
    %7 = tpu.matmul %5, %6, %cst {dimension_numbers = #tpu.dot_dimension_numbers<[1], [0], [0], [1], [0, 0, 1, 1], [], []>} : vector<8x64xf32>, vector<64x128xf32>, vector<8x128xf32> -> vector<8x128xf32>
    %c0_3 = arith.constant 0 : index
    %c0_4 = arith.constant 0 : index
    %8 = vector.load %arg3[%c0_3, %c0_4] : memref<8x128xf32, #tpu.memory_space<vmem>>, vector<8x128xf32>
    %9 = arith.addf %7, %8 : vector<8x128xf32>
    %c0_5 = arith.constant 0 : index
    %c0_6 = arith.constant 0 : index
    %10 = vector.load %arg4[%c0_5, %c0_6] : memref<8x128xf32, #tpu.memory_space<vmem>>, vector<8x128xf32>
    tpu.vector_store %arg4[%c0_5, %c0_6], %9 {strides = array<i32>} : memref<8x128xf32, #tpu.memory_space<vmem>>, vector<8x128xf32>,
    return
  }
  func.func @transform_0(%arg0: i32) -> (i32, i32) {
    %c0_i32 = arith.constant 0 : i32
    %c0_i32_0 = arith.constant 0 : i32
    return %arg0, %c0_i32 : i32, i32
  }
  func.func @transform_1(%arg0: i32) -> (i32, i32) {
    %c0_i32 = arith.constant 0 : i32
    %c0_i32_0 = arith.constant 0 : i32
    %c0_i32_1 = arith.constant 0 : i32
    return %c0_i32, %c0_i32_0 : i32, i32
  }
  func.func @transform_2(%arg0: i32) -> (i32, i32) {
    %c0_i32 = arith.constant 0 : i32
    %c0_i32_0 = arith.constant 0 : i32
    %c0_i32_1 = arith.constant 0 : i32
    return %c0_i32, %c0_i32_0 : i32, i32
  }
  func.func @transform_3(%arg0: i32) -> (i32, i32) {
    %c0_i32 = arith.constant 0 : i32
    %c0_i32_0 = arith.constant 0 : i32
    return %arg0, %c0_i32 : i32, i32
  }
}

</mosaic_0001>

<bundles_post_ra>
// kernel: tpu_custom_call.1
= control target key start
LH: loop header
LB: loop body
LE: loop exit
PB: predicated region body
PF: predicated region fallthrough
CT: control target
= control target key end

     0   :  { %8 = vsyncpa [#allocation3], 0  ;;  %s732_s0 = inlined_call_operand.vmem [shape: s32[16,1], index: 0, kind: input, shape index: {}]   ;;  %s733_s1 = inlined_call_operand.hbm [shape: f32[64,128], index: 1, kind: input, shape index: {}]   ;;  %s734_s2 = inlined_call_operand.vmem [shape: f32[8,128], index: 2, kind: input, shape index: {}]   ;;  %s735_s3 = inlined_call_operand.hbm [shape: f32[16,128], index: 3, kind: output, shape index: {}]  }
   0x1   :  { %9 = vsyncpa [#allocation4], 0 }
   0x2   :  { %11 = vsyncpa [#allocation4 + $0x1], 0  ;;  %s594_s12 = smov 0   ;;  %s596_s13 = smov 0  }
   0x3   :  { %s598_s14 = smov 0   ;;  %s600_s15 = smov 0  }
   0x4 LB: > { %s615_s16 = sadd.s32 4294967295, %s564_s15   ;;  %s359_s17 = sadd.s32 4294967294, %s564_s15   ;;  %s564_s15 = sphi %s600_s15, %s751_s15   ;;  %s560_s14 = sphi %s598_s14, %s750_s14   ;;  %s556_s13 = sphi %s596_s13, %s749_s13   ;;  %s552_s12 = sphi %s594_s12, %s748_s12  }
   0x5   : > { %s619_s18 = sadd.s32 1, %s564_s15   ;;  %s92_s19 = sadd.s32 1, %s560_s14 }
   0x6   : > { %s89_s20 = ssub.s32 %s564_s15, %s619_s18  ;;  %p102_p0 = scmp.ne.s32.totalorder %s560_s14, %s556_s13 }
   0x7   : > { %p90_p1 = scmp.eq.s32.totalorder %s89_s20, 0  ;;  %p103_p2 = scmp.eq.s32.totalorder %s615_s16, 1 }
   0x8   : > { %p108_p3 = scmp.ne.s32.totalorder %s556_s13, %s552_s12  ;;  %p109_p4 = scmp.eq.s32.totalorder %s359_s17, 1 }
   0x9   : > { %s630_s21 = scalar_select %p90_p1, %s560_s14, %s92_s19  }
   0xa   : > { %p632_p5 = por %p103_p2, %p102_p0  ;;  %p636_p6 = por %p109_p4, %p108_p3 }
   0xb   : > { %p360_p7 = scmp.ge.s32.totalorder %s564_s15, 1  ;;  %p116_p8 = scmp.lt.s32.totalorder %s564_s15, 3 }
   0xc   : > { %s739_s22 = scalar_select %p632_p5, 1, 0 }
   0xd   : > { %s740_s23 = scalar_select %p636_p6, 1, 0 }
   0xe   : > { %p736_p9 = scmp.eq.s32.totalorder %s615_s16, 0  ;;  %p643_p10 = pnand %p360_p7, %p116_p8 }
   0xf   : > { %s566_s25 = smov [#allocation2]   ;;  %s470_s30 = scalar_lea.hbm %s733_s1, 1024 }
  0x10   : > { %s741_s24 = scalar_select %p643_p10, 1, 0 }
  0x11   : > { %s128_s26 = sshll.u32 %s566_s25, 4  ;;  %p419_p11 = pneg %p643_p10  ;;  %s129_s26 = int_to_ptr.vmem [resolvable:$true] %s128_s26 }
  0x12   : > { %p471_p13 = scmp.ne.s32.totalorder %s733_s1, %s470_s30  ;;  %p477_p3 = scmp.lt.u32.totalorder %s470_s30, %s733_s1 }
  0x13   : > { %p651_p12 = pnand %p736_p9, %p419_p11 }
  0x15   : > { %p472_p0 = pneg %p651_p12 }
  0x17   : > { %p473_p1 = pnand %p472_p0, %p471_p13 }
  0x19   : > { %p474_p2 = pneg %p473_p1 }
  0x1b   : > { %p479_p4 = pnand %p477_p3, %p474_p2 }
  0x1d   : > { %482 = shalt.err (!%p479_p4)
}
  0x1e   : > { %s483_s8 = scalar_lea.vmem %s129_s26, 1024  ;;  %p491_p9 = scmp.lt.s32.totalorder %s129_s26, %s129_s26 }
  0x1f   : > { %p484_p7 = scmp.ne.s32.totalorder %s129_s26, %s483_s8  ;;  %p492_p6 = scmp.lt.s32.totalorder %s483_s8, %s483_s8 }
  0x21   : > { %p486_p8 = pnand %p484_p7, %p472_p0  ;;  %p493_p5 = por %p492_p6, %p491_p9 }
  0x23   : > { %p487_p11 = pneg %p486_p8 }
  0x25   : > { %p494_p10 = pnand %p493_p5, %p487_p11 }
  0x27   : > { %497 = shalt.err (!%p494_p10)
}
  0x28   : > { %s567_s9 = smov 128   ;;  %s568_s10 = smov 8  }
  0x29   : > { %422 = dma.hbm_to_vmem [thread:$0]  (!%p651_p12), %s733_s1, 1024, %s129_s26, [#allocation3], %s567_s9, %s567_s9, %s568_s10  }
  0x2a   : > { %p743_p13 = scmp.ne.s32.totalorder %s741_s24, 0 }
  0x2b   : > { %p744_p1 = scmp.eq.s32.totalorder (!%p743_p13), %s615_s16, 0 }
  0x2c   : > { %154 = sbr.rel (%p743_p13) target bundleno = 417 (0x1a1), region = 32 }
  0x33   : > { %543 = dma.done.wait (%p744_p1), [#allocation3], 1024   ;;  %p745_p0 = pmov %p744_p1 }
  0x34   : > { %p177_p5 = scmp.lt.s32.totalorder %s615_s16, 1  ;;  %v569_v0 = vmov 0   ;;  %v570_v1 = vmov 0.0|0.0   ;;  %v190_v3 = vld [vmem:[#allocation2] sm:$0xff]  ;;  %v191_v4 = vld [vmem:[#allocation2 + $0x8] sm:$0xff]  ;;  %v192_v6 = vld [vmem:[#allocation2 + $0x10] sm:$0xff]  ;;  %v182_v16 = vlaneseq }
  0x35   : > { %545 = vsyncadd (%p745_p0), [#allocation3], 4294966272  ;;  %469 = vset.pattern.permute.xlu0 %v569_v0  ;;  %401 = vmatprep.subr.bf16.mxu0 %v570_v1  ;;  %v402_v5 = vpack.c.bf16 %v191_v4, %v190_v3  ;;  %v193_v7 = vld [vmem:[#allocation2 + $0x18] sm:$0xff]  ;;  %vm571_vm0 = vmmov 0   ;;  %v572_v8 = vmov 0.0   ;;  %v194_v10 = vld [vmem:[#allocation2 + $0x20] sm:$0xff] }
  0x36   : > { %s178_s19 = scalar_select %p177_p5, %s615_s16, 1  ;;  %398 = vmatprep.mubr.msk.f32.mxu0 %vm571_vm0, %v572_v8  ;;  %v405_v9 = vpack.c.bf16 %v193_v7, %v192_v6  ;;  %v195_v11 = vld [vmem:[#allocation2 + $0x28] sm:$0xff]  ;;  %v196_v13 = vld [vmem:[#allocation2 + $0x30] sm:$0xff]  ;;  %v197_v14 = vld [vmem:[#allocation2 + $0x38] sm:$0xff]  ;;  %v183_v17 = vand.u32 127, %v182_v16  ;;  %vm199_vm1 = vcmask 523264  }
  0x37   : > { %403 = vmatpush3.bf16.msra.mxu0 %v402_v5  ;;  %v408_v12 = vpack.c.bf16 %v195_v11, %v194_v10  ;;  %v411_v15 = vpack.c.bf16 %v197_v14, %v196_v13  ;;  %s174_s27 = sand.u32 1, %s556_s13   ;;  %v198_v20 = vld [vmem:[%s734_s2] sm:$0xff]  ;;  %s370_s4 = sshll.u32 %s615_s16, 7 }
  0x38   : > { %s366_s20 = sshll.u32 %s178_s19, 3  ;;  %404 = vmatprep.subr.bf16.mxu0 %v570_v1  ;;  %s365_s28 = sshll.u32 %s174_s27, 3 }
  0x39   : > { %s180_s24 = scalar_lea.vmem %s732_s0, %s366_s20  ;;  %s176_s5 = scalar_lea.vmem [#allocation5], %s365_s28 }
  0x3a   : > { %v181_v2 = vld [vmem:[%s180_s24] sm:$0xff]  ;;  %s288_s6 = sshll.u32 %s176_s5, 4  ;;  %s690_s9 = scalar_lea.hbm %s735_s3, %s370_s4  ;;  %s692_s6 = int_to_ptr.vmem [resolvable:$true] %s288_s6 }
  0x3b   : > { %185 = vperm.xlu0 %469, %v181_v2   ;;  %406 = vmatpush3.bf16.msra.mxu0 %v405_v9  ;;  %s275_s10 = scalar_lea.sflag [#allocation4], %s174_s27  ;;  %s498_s11 = scalar_lea.vmem %s692_s6, 128 }
  0x3c   : > { %407 = vmatprep.subr.bf16.mxu0 %v570_v1  ;;  %p499_p6 = scmp.ne.s32.totalorder %s692_s6, %s498_s11  ;;  %p746_p9 = scmp.ne.s32.totalorder %s739_s22, 0 }
  0x3d   : > { %s573_s16 = smov [#allocation5]  }
  0x3e   : > { %p500_p10 = pnand %p499_p6, %p746_p9  ;;  %s502_s17 = sshll.u32 %s573_s16, 4  ;;  %s503_s17 = int_to_ptr.vmem [resolvable:$false] %s502_s17 }
  0x3f   : > { %409 = vmatpush3.bf16.msra.mxu0 %v408_v12  ;;  %s504_s19 = scalar_lea.vmem %s503_s17, 256  ;;  %p505_p2 = scmp.lt.s32.totalorder %s692_s6, %s503_s17 }
  0x40   : > { %410 = vmatprep.subr.bf16.mxu0 %v570_v1  ;;  %p501_p12 = pneg %p500_p10  ;;  %p506_p3 = scmp.lt.s32.totalorder %s504_s19, %s498_s11 }
  0x42   : > { %p507_p4 = por %p506_p3, %p505_p2 }
  0x43   : > { %412 = vmatpush3.bf16.msra.mxu0 %v411_v15 }
  0x44   : > { %p508_p7 = pnand %p507_p4, %p501_p12 }
  0xba   : > { %v186_v18 = vpop.permute.xlu0 %185 }
  0xbb   : > { %vm187_vm2 = vcmp.eq.s32.totalorder %v186_v18, %v183_v17 }
  0xbc   : > { %v367_v19 = vsel %vm187_vm2, 1.0, %v572_v8 }
  0xbd   : > { %399 = vmatmul.mubr.msk.f32.vlgmr.msra.gmra.mrb[0].mxu0 %vm199_vm1, %v367_v19 }
 0x190   : > { %v269_v21 = vpop.f32.mrb[0].mxu0 }
 0x191   : > { %v270_v22 = vadd.f32 %v269_v21, %v198_v20  ;;  %v400_v23 = vpop.f32.mrb[1].mxu0 }
 0x193   : > { %273 = vst [vmem:[%s176_s5] sm:$0xff] %v270_v22 }
 0x194   : > { %511 = shalt.err (!%p508_p7)
}
 0x195   : > { %s512_s20 = scalar_lea.hbm %s690_s9, 128  ;;  %s516_s24 = scalar_lea.hbm %s735_s3, 256 }
 0x196   : > { %p513_p8 = scmp.ne.s32.totalorder %s690_s9, %s512_s20  ;;  %p517_p1 = scmp.lt.u32.totalorder %s690_s9, %s735_s3 }
 0x197   : > { %p518_p0 = scmp.lt.u32.totalorder %s516_s24, %s512_s20  ;;  %p520_p6 = scmp.lt.u32.totalorder %s512_s20, %s690_s9 }
 0x198   : > { %p514_p11 = pnand %p513_p8, %p746_p9 }
 0x199   : > { %p519_p5 = por %p518_p0, %p517_p1 }
 0x19a   : > { %p515_p13 = pneg %p514_p11 }
 0x19b   : > { %p521_p10 = por %p520_p6, %p519_p5 }
 0x19d   : > { %p522_p12 = pnand %p521_p10, %p515_p13 }
 0x19f   : > { %525 = shalt.err (!%p522_p12)
}
 0x1a0   : > { %417 = dma.vmem_to_hbm [thread:$0]  (%p746_p9), %s692_s6, 128, %s690_s9, %s275_s10  }
 0x1a1 PF: > { %p429_p2 = scmp.ge.s32.totalorder %s564_s15, 2  ;;  %s300_s29 = sand.u32 1, %s552_s12  }
 0x1a2   : > { %p747_p3 = scmp.ne.s32.totalorder %s740_s23, 0  ;;  %s301_s30 = scalar_lea.sflag [#allocation4], %s300_s29 }
 0x1a4   : > { %p424_p4 = pnand %p429_p2, %p747_p3 }
 0x1a6   : > { %547 = dma.done.wait (!%p424_p4), %s301_s30, 128  }
 0x1a7   : > { %549 = vsyncadd (!%p424_p4), %s301_s30, 4294967168  ;;  %p14_p7 = scmp.ge.s32.totalorder %s619_s18, 4   ;;  %s748_s12 = smov %s556_s13 }
 0x1a8   : > { %s749_s13 = smov %s560_s14  ;;  %s750_s14 = smov %s630_s21 }
 0x1a9   : > { %s751_s15 = smov %s619_s18  ;;  %16 = sbr.rel (!%p14_p7) target bundleno = 4 (0x4), region = 72 }
 0x1b0   :  { %306 = vsyncpa [#allocation3], 1 }
 0x1b1   :  { %308 = vsyncpa [#allocation3 + $0x1], 1 }
 0x1b2   :  { %309 = vsyncpa [#allocation4], 1 }
 0x1b3   :  { %311 = vsyncpa [#allocation4 + $0x1], 1 }

</bundles_post_ra>
